<compile_context>
chip_gen: v7x
topology: tpu7x:2x2x1
jax: 0.10.0
libtpu: 0.0.40
codegen_flags: <defaults>
</compile_context>

<pallas_src>
import functools

import jax
import jax.numpy as jnp
from jax.experimental import pallas as pl
from jax.experimental.pallas import tpu as pltpu


def _round_up(x, m):
    return ((x + m - 1) // m) * m


def _cdiv(a, b):
    return -(-a // b)


def _proto_ce_kernel(preds_ref, mc_ref, labels_ref, out_ref, *,
                     tile_n, tiles_per_core, n_valid):
    # preds_ref : (C, TILE_N)          target-loss logits, class-major
    # mc_ref    : (1, C, TILE_N)       logits of channel (s-1), class-major
    # labels_ref: (1, TILE_N) int32    labels, shared by every slab
    # out_ref   : (1, 2, TILE_N) f32   per-core lane-dense accumulator
    #                                  row 0: target-loss, row 1: multi-chan
    p = pl.program_id(0)   # core slot (v7x megacore split)
    i = pl.program_id(1)   # column tile within this core
    s = pl.program_id(2)   # slab: 0 -> preds, 1..nchan -> channel s-1

    @pl.when((i == 0) & (s == 0))
    def _init():
        out_ref[...] = jnp.zeros_like(out_ref)

    is_target = s == 0

    # Select the logits source for this slab (both blocks live in VMEM; the
    # select is a cheap VPU op and the unused block is never re-DMA'd).
    logits = jnp.where(is_target,
                       preds_ref[...].astype(jnp.float32),
                       mc_ref[0].astype(jnp.float32))               # (C, T)
    labels = labels_ref[...]                                         # (1, T)

    # Numerically-stable log-sum-exp over the (small) class / sublane axis.
    m = jnp.max(logits, axis=0, keepdims=True)                       # (1, T)
    lse = jnp.log(jnp.sum(jnp.exp(logits - m), axis=0, keepdims=True)) + m

    class_ids = jax.lax.broadcasted_iota(jnp.int32, logits.shape, 0)
    picked = jnp.sum(jnp.where(class_ids == labels, logits, 0.0),
                     axis=0, keepdims=True)                          # (1, T)

    loss = lse - picked                                              # (1, T)

    # Mask tail columns of the last tile and phantom tiles of the second
    # core.  where-select (not multiply-by-zero) so Inf/NaN garbage in the
    # unpadded tail can never poison the accumulator.
    t_global = p * tiles_per_core + i
    col = t_global * tile_n + jax.lax.broadcasted_iota(
        jnp.int32, (1, tile_n), 1)
    loss = jnp.where(col < n_valid, loss, 0.0)

    # Deferred reduction: route the masked per-column losses into the tl /
    # mcl row of the resident lane-dense accumulator (pure VPU adds).
    row = jax.lax.broadcasted_iota(jnp.int32, (1, 2, tile_n), 1)
    want_row = jnp.minimum(s, 1)                                     # 0: tl, 1: mcl
    out_ref[...] += jnp.where(row == want_row,
                              loss.reshape(1, 1, tile_n), 0.0)


def proto_loss(preds, targets, multi_channels_preds, *, tile_n=8192):
    """JAX/Pallas equivalent of ProtoLoss.forward.

    preds:                (B, L, C)        float (f32 or bf16)
    targets:              (B, L)           int
    multi_channels_preds: (B, L, nchan, C) float (f32 or bf16)
    returns (tl, mcl) float32 scalars
    """
    batch, L, nchan, nclasses = multi_channels_preds.shape
    n1 = batch * L
    n2 = n1 * nchan

    # Class-major (lane-dense) views: one transpose pass per source, no
    # concat / pad / label-broadcast passes.  Column order of the mc logits
    # is channel-major so every slab reuses the same (1, n1) label row.
    preds_t = preds.reshape(n1, nclasses).T                          # (C, n1)
    mc_t = jnp.transpose(
        multi_channels_preds.reshape(n1, nchan, nclasses), (1, 2, 0))  # (nchan, C, n1)
    labels = targets.reshape(1, n1).astype(jnp.int32)                # (1, n1)

    # Tile sizing: big tiles (default 8192 lanes) to amortize per-step
    # overhead, clamped for small inputs; VMEM per block stays well under
    # the 32 MiB scoped limit on every generation.
    tile_n = max(128, min(_round_up(tile_n, 128), _round_up(n1, 128)))

    # Tiny inputs only (n1 < one vreg of lanes): pad the lane axis up to 128
    # so no block ever exceeds the whole array.  For realistic sizes nothing
    # is padded; the in-kernel mask handles the partial last tile.
    if n1 < 128:
        pad = 128 - n1
        preds_t = jnp.pad(preds_t, ((0, 0), (0, pad)))
        mc_t = jnp.pad(mc_t, ((0, 0), (0, 0), (0, pad)))
        labels = jnp.pad(labels, ((0, 0), (0, pad)))

    num_tiles = _cdiv(n1, tile_n)
    n_split = 2 if num_tiles > 1 else 1        # engage both v7x TensorCores
    tiles_per_core = _cdiv(num_tiles, n_split)

    kernel = functools.partial(_proto_ce_kernel, tile_n=tile_n,
                               tiles_per_core=tiles_per_core, n_valid=n1)

    def col_tile(p, i, s):
        # Clamp phantom tiles of the second core; the kernel masks them out
        # (their global column index is >= n1).
        return jnp.minimum(p * tiles_per_core + i, num_tiles - 1)

    out = pl.pallas_call(
        kernel,
        out_shape=jax.ShapeDtypeStruct((n_split, 2, tile_n), jnp.float32),
        grid_spec=pltpu.PrefetchScalarGridSpec(
            num_scalar_prefetch=0,
            grid=(n_split, tiles_per_core, nchan + 1),
            in_specs=[
                # preds tile: fetched once per column tile (index ignores s)
                pl.BlockSpec((nclasses, tile_n),
                             lambda p, i, s: (0, col_tile(p, i, s))),
                # mc tile: channel s-1 of this column tile; the s==0 step
                # prefetches channel 0, so each channel block is DMA'd once.
                pl.BlockSpec((1, nclasses, tile_n),
                             lambda p, i, s: (jnp.maximum(s - 1, 0), 0,
                                              col_tile(p, i, s))),
                # shared label row: fetched once per column tile
                pl.BlockSpec((1, tile_n),
                             lambda p, i, s: (0, col_tile(p, i, s))),
            ],
            out_specs=pl.BlockSpec((1, 2, tile_n),
                                   lambda p, i, s: (p, 0, 0)),
        ),
        compiler_params=pltpu.CompilerParams(
            dimension_semantics=("parallel", "arbitrary", "arbitrary"),
            vmem_limit_bytes=32 * 1024 * 1024,
        ),
    )(preds_t, mc_t, labels)

    # Tiny final reduction (a few KB) + the 1/N means, done in the wrapper.
    tl = jnp.sum(out[:, 0, :]) / n1
    mcl = jnp.sum(out[:, 1, :]) / n2
    return tl, mcl


# ----------------------------- pure-JAX reference ---------------------------

def _ce_mean_ref(logits, labels):
    logp = jax.nn.log_softmax(logits.astype(jnp.float32), axis=-1)
    picked = jnp.take_along_axis(logp, labels[:, None].astype(jnp.int32), axis=-1)
    return -jnp.mean(picked)


def _proto_loss_ref(preds, targets, multi_channels_preds):
    batch, L, nchan, nclasses = multi_channels_preds.shape
    tl = _ce_mean_ref(preds.reshape(-1, nclasses), targets.reshape(-1))
    tgt_rep = jnp.broadcast_to(targets.reshape(batch, L, 1), (batch, L, nchan))
    mcl = _ce_mean_ref(multi_channels_preds.reshape(-1, nclasses),
                       tgt_rep.reshape(-1))
    return tl, mcl


if __name__ == "__main__":
    key = jax.random.PRNGKey(0)
    k1, k2, k3, k4, k5, k6 = jax.random.split(key, 6)

    # Case 1: small shapes implied by the module (single tile, one core slot).
    batch, L, nchan, nclasses = 2, 8, 4, 5
    preds = jax.random.normal(k1, (batch, L, nclasses), dtype=jnp.float32)
    targets = jax.random.randint(k2, (batch, L), 0, nclasses, dtype=jnp.int32)
    mcp = jax.random.normal(k3, (batch, L, nchan, nclasses), dtype=jnp.float32)

    tl, mcl = jax.jit(proto_loss)(preds, targets, mcp)
    jax.block_until_ready((tl, mcl))
    tl_ref, mcl_ref = _proto_loss_ref(preds, targets, mcp)
    assert jnp.allclose(tl, tl_ref, atol=1e-5), (tl, tl_ref)
    assert jnp.allclose(mcl, mcl_ref, atol=1e-5), (mcl, mcl_ref)

    # Case 2: multi-tile with an odd tile count and a non-aligned n1 ->
    # exercises the 2-core split, the phantom-tile clamp and the unpadded
    # tail masking (tile_n=128, n1=300 -> 3 tiles).
    b2, l2, c2, cls2 = 4, 75, 3, 5
    preds2 = jax.random.normal(k4, (b2, l2, cls2), dtype=jnp.float32)
    targets2 = jax.random.randint(k5, (b2, l2), 0, cls2, dtype=jnp.int32)
    mcp2 = jax.random.normal(k6, (b2, l2, c2, cls2), dtype=jnp.float32)

    tl2, mcl2 = jax.jit(functools.partial(proto_loss, tile_n=128))(
        preds2, targets2, mcp2)
    jax.block_until_ready((tl2, mcl2))
    tl2_ref, mcl2_ref = _proto_loss_ref(preds2, targets2, mcp2)
    assert jnp.allclose(tl2, tl2_ref, atol=1e-5), (tl2, tl2_ref)
    assert jnp.allclose(mcl2, mcl2_ref, atol=1e-5), (mcl2, mcl2_ref)

    print("KERNEL_OK")
</pallas_src>

<mosaic_0001>
module attributes {stable_mosaic.version = 11 : i64} {
  func.func @_proto_ce_kernel(%arg0: i32, %arg1: i32, %arg2: i32, %arg3: memref<5x128xf32, #tpu.memory_space<vmem>>, %arg4: memref<1x5x128xf32, #tpu.memory_space<vmem>>, %arg5: memref<1x128xi32, #tpu.memory_space<vmem>>, %arg6: memref<1x2x128xf32, #tpu.memory_space<vmem>>) attributes {dimension_semantics = [#tpu.dimension_semantics<parallel>, #tpu.dimension_semantics<arbitrary>, #tpu.dimension_semantics<arbitrary>], iteration_bounds = array<i64: 1, 1, 5>, scalar_prefetch = 0 : i64, scratch_operands = 0 : i64, tpu.core_type = #tpu.core_type<tc>, window_params = [{transform_indices = @transform_0, window_bounds = array<i64: 5, 128>}, {transform_indices = @transform_1, window_bounds = array<i64: 1, 5, 128>}, {transform_indices = @transform_2, window_bounds = array<i64: 1, 128>}, {transform_indices = @transform_3, window_bounds = array<i64: 1, 2, 128>}]} {
    %c0_i32 = arith.constant 0 : i32
    %0 = arith.cmpi eq, %arg1, %c0_i32 : i32
    %c0_i32_0 = arith.constant 0 : i32
    %1 = arith.cmpi eq, %arg2, %c0_i32_0 : i32
    %2 = arith.andi %0, %1 : i1
    %3 = arith.extui %2 : i1 to i32
    %c0_i32_1 = arith.constant 0 : i32
    %4 = arith.cmpi ne, %3, %c0_i32_1 : i32
    scf.if %4 {
      %cst_21 = arith.constant 0.000000e+00 : f32
      %50 = vector.broadcast %cst_21 : f32 to vector<1x2x128xf32>
      %c0_22 = arith.constant 0 : index
      %c0_23 = arith.constant 0 : index
      %c0_24 = arith.constant 0 : index
      %51 = vector.load %arg6[%c0_22, %c0_23, %c0_24] : memref<1x2x128xf32, #tpu.memory_space<vmem>>, vector<1x2x128xf32>
      tpu.vector_store %arg6[%c0_22, %c0_23, %c0_24], %50 {strides = array<i32>} : memref<1x2x128xf32, #tpu.memory_space<vmem>>, vector<1x2x128xf32>,
    } else {
    }
    %c0_i32_2 = arith.constant 0 : i32
    %5 = arith.cmpi eq, %arg2, %c0_i32_2 : i32
    %c0 = arith.constant 0 : index
    %c0_3 = arith.constant 0 : index
    %6 = vector.load %arg3[%c0, %c0_3] : memref<5x128xf32, #tpu.memory_space<vmem>>, vector<5x128xf32>
    %c0_4 = arith.constant 0 : index
    %c0_5 = arith.constant 0 : index
    %c0_6 = arith.constant 0 : index
    %7 = vector.load %arg4[%c0_4, %c0_5, %c0_6] : memref<1x5x128xf32, #tpu.memory_space<vmem>>, vector<1x5x128xf32>
    %8 = vector.shape_cast %7 : vector<1x5x128xf32> to vector<5x128xf32>
    %9 = arith.select %5, %6, %8 : vector<5x128xf32>
    %c0_7 = arith.constant 0 : index
    %c0_8 = arith.constant 0 : index
    %10 = vector.load %arg5[%c0_7, %c0_8] : memref<1x128xi32, #tpu.memory_space<vmem>>, vector<1x128xi32>
    %cst = arith.constant dense<0xFF800000> : vector<128xf32>
    %11 = vector.multi_reduction <maximumf>, %9, %cst [0] : vector<5x128xf32> to vector<128xf32>
    %12 = vector.shape_cast %11 : vector<128xf32> to vector<1x128xf32>
    %13 = vector.broadcast %12 : vector<1x128xf32> to vector<5x128xf32>
    %14 = arith.subf %9, %13 : vector<5x128xf32>
    %15 = math.exp %14 : vector<5x128xf32>
    %cst_9 = arith.constant dense<0.000000e+00> : vector<128xf32>
    %16 = vector.multi_reduction <add>, %15, %cst_9 [0] : vector<5x128xf32> to vector<128xf32>
    %17 = vector.shape_cast %16 : vector<128xf32> to vector<1x128xf32>
    %18 = math.log %17 : vector<1x128xf32>
    %19 = arith.addf %18, %12 : vector<1x128xf32>
    %20 = tpu.iota {dimensions = array<i32: 0>} : vector<5x128xi32>
    %21 = vector.broadcast %10 : vector<1x128xi32> to vector<5x128xi32>
    %22 = arith.cmpi eq, %20, %21 : vector<5x128xi32>
    %cst_10 = arith.constant 0.000000e+00 : f32
    %23 = vector.broadcast %cst_10 : f32 to vector<5x128xf32>
    %24 = arith.select %22, %9, %23 : vector<5x128xi1>, vector<5x128xf32>
    %cst_11 = arith.constant dense<0.000000e+00> : vector<128xf32>
    %25 = vector.multi_reduction <add>, %24, %cst_11 [0] : vector<5x128xf32> to vector<128xf32>
    %26 = vector.shape_cast %25 : vector<128xf32> to vector<1x128xf32>
    %27 = arith.subf %19, %26 : vector<1x128xf32>
    %c1_i32 = arith.constant 1 : i32
    %28 = arith.muli %arg0, %c1_i32 : i32
    %29 = arith.addi %28, %arg1 : i32
    %c128_i32 = arith.constant 128 : i32
    %30 = arith.muli %29, %c128_i32 : i32
    %31 = tpu.iota {dimensions = array<i32: 1>} : vector<1x128xi32>
    %32 = vector.broadcast %30 : i32 to vector<1x128xi32>
    %33 = arith.addi %32, %31 : vector<1x128xi32>
    %c16_i32 = arith.constant 16 : i32
    %34 = vector.broadcast %c16_i32 : i32 to vector<1x128xi32>
    %35 = arith.cmpi slt, %33, %34 : vector<1x128xi32>
    %cst_12 = arith.constant 0.000000e+00 : f32
    %36 = vector.broadcast %cst_12 : f32 to vector<1x128xf32>
    %37 = arith.select %35, %27, %36 : vector<1x128xi1>, vector<1x128xf32>
    %38 = tpu.iota {dimensions = array<i32: 1>} : vector<1x2x128xi32>
    %c1_i32_13 = arith.constant 1 : i32
    %39 = arith.minsi %arg2, %c1_i32_13 : i32
    %c0_14 = arith.constant 0 : index
    %c0_15 = arith.constant 0 : index
    %c0_16 = arith.constant 0 : index
    %40 = vector.load %arg6[%c0_14, %c0_15, %c0_16] : memref<1x2x128xf32, #tpu.memory_space<vmem>>, vector<1x2x128xf32>
    %41 = vector.broadcast %39 : i32 to vector<1x2x128xi32>
    %42 = arith.cmpi eq, %38, %41 : vector<1x2x128xi32>
    %43 = vector.shape_cast %37 : vector<1x128xf32> to vector<1x1x128xf32>
    %cst_17 = arith.constant 0.000000e+00 : f32
    %44 = vector.shape_cast %43 : vector<1x1x128xf32> to vector<1x1x128xf32>
    %45 = vector.broadcast %44 : vector<1x1x128xf32> to vector<1x2x128xf32>
    %46 = vector.broadcast %cst_17 : f32 to vector<1x2x128xf32>
    %47 = arith.select %42, %45, %46 : vector<1x2x128xi1>, vector<1x2x128xf32>
    %48 = arith.addf %40, %47 : vector<1x2x128xf32>
    %c0_18 = arith.constant 0 : index
    %c0_19 = arith.constant 0 : index
    %c0_20 = arith.constant 0 : index
    %49 = vector.load %arg6[%c0_18, %c0_19, %c0_20] : memref<1x2x128xf32, #tpu.memory_space<vmem>>, vector<1x2x128xf32>
    tpu.vector_store %arg6[%c0_18, %c0_19, %c0_20], %48 {strides = array<i32>} : memref<1x2x128xf32, #tpu.memory_space<vmem>>, vector<1x2x128xf32>,
    return
  }
  func.func @transform_0(%arg0: i32, %arg1: i32, %arg2: i32) -> (i32, i32) {
    %c1_i32 = arith.constant 1 : i32
    %0 = arith.muli %arg0, %c1_i32 : i32
    %1 = arith.addi %0, %arg1 : i32
    %c0_i32 = arith.constant 0 : i32
    %2 = arith.minsi %1, %c0_i32 : i32
    %c0_i32_0 = arith.constant 0 : i32
    %c0_i32_1 = arith.constant 0 : i32
    return %c0_i32_0, %2 : i32, i32
  }
  func.func @transform_1(%arg0: i32, %arg1: i32, %arg2: i32) -> (i32, i32, i32) {
    %c1_i32 = arith.constant 1 : i32
    %0 = arith.subi %arg2, %c1_i32 : i32
    %c0_i32 = arith.constant 0 : i32
    %1 = arith.maxsi %0, %c0_i32 : i32
    %c1_i32_0 = arith.constant 1 : i32
    %2 = arith.muli %arg0, %c1_i32_0 : i32
    %3 = arith.addi %2, %arg1 : i32
    %c0_i32_1 = arith.constant 0 : i32
    %4 = arith.minsi %3, %c0_i32_1 : i32
    %c0_i32_2 = arith.constant 0 : i32
    %c0_i32_3 = arith.constant 0 : i32
    return %1, %c0_i32_2, %4 : i32, i32, i32
  }
  func.func @transform_2(%arg0: i32, %arg1: i32, %arg2: i32) -> (i32, i32) {
    %c1_i32 = arith.constant 1 : i32
    %0 = arith.muli %arg0, %c1_i32 : i32
    %1 = arith.addi %0, %arg1 : i32
    %c0_i32 = arith.constant 0 : i32
    %2 = arith.minsi %1, %c0_i32 : i32
    %c0_i32_0 = arith.constant 0 : i32
    %c0_i32_1 = arith.constant 0 : i32
    return %c0_i32_0, %2 : i32, i32
  }
  func.func @transform_3(%arg0: i32, %arg1: i32, %arg2: i32) -> (i32, i32, i32) {
    %c0_i32 = arith.constant 0 : i32
    %c0_i32_0 = arith.constant 0 : i32
    %c0_i32_1 = arith.constant 0 : i32
    return %arg0, %c0_i32, %c0_i32_0 : i32, i32, i32
  }
}

</mosaic_0001>

<bundles_post_ra>
// kernel: proto_loss.1
= control target key start
LH: loop header
LB: loop body
LE: loop exit
PB: predicated region body
PF: predicated region fallthrough
CT: control target
= control target key end

     0   :  { %s567_s12 = smov 0   ;;  %s569_s13 = smov 0   ;;  %s621_s0 = inlined_call_operand.vmem [shape: f32[5,128], index: 0, kind: input, shape index: {}]   ;;  %s622_s1 = inlined_call_operand.vmem [shape: f32[4,5,128], index: 1, kind: input, shape index: {}]   ;;  %s623_s2 = inlined_call_operand.vmem [shape: s32[1,128], index: 2, kind: input, shape index: {}]   ;;  %s624_s3 = inlined_call_operand.vmem [shape: f32[1,2,128], index: 3, kind: output, shape index: {}]  }
   0x1   :  { %s571_s14 = smov 0  }
   0x2 LB: > { %s25_s15 = sadd.s32 1, %s540_s13  ;;  %p477_p0 = scmp.ge.s32.totalorder %s544_s14, 1  ;;  %s544_s14 = sphi %s571_s14, %s13_s14   ;;  %s540_s13 = sphi %s569_s13, %s626_s13   ;;  %s536_s12 = sphi %s567_s12, %s625_s12  }
   0x3   : > { %p26_p1 = scmp.ge.s32.totalorder %s25_s15, 5  ;;  %p225_p2 = scmp.lt.s32.totalorder %s544_s14, 6 }
   0x5   : > { %s628_s15 = smov (%p26_p1, %s25_s15), 0  ;;  %p226_p3 = pnand %p477_p0, %p225_p2 }
   0x6   : > { %s478_s16 = sadd.s32 (!%p226_p3), 4294967295, %s536_s12  ;;  %p312_p4 = scmp.eq.s32.totalorder (!%p226_p3), %s536_s12, 0 }
   0x7   : > { %229 = sbr.rel (%p226_p3) target bundleno = 89 (0x59), region = 32  ;;  %p280_p5 = scmp.gt.s32.totalorder (!%p226_p3), %s478_s16, 0 }
   0x8   : > { %p479_p6 = scmp.lt.s32.totalorder (!%p226_p3), %s478_s16, 3 }
   0xe   : > { %s630_s16 = smov (!%p280_p5, %s478_s16), 0  ;;  %316 = sbr.rel (!%p312_p4) target bundleno = 21 (0x15), region = 36 }
   0xf   : > { %s632_s16 = smov (!%p479_p6, %s630_s16), 3  ;;  %v546_v0 = vmov (%p312_p4), 0.0  }
  0x10   : > { %s484_s17 = sshll.u32 %s632_s16, 3  ;;  %317 = vst [vmem:[%s624_s3] sm:$0x3] (%p312_p4), %v546_v0 }
  0x11   : > { %s291_s20 = scalar_lea.vmem %s622_s1, %s484_s17 }
  0x15 PF: > { %s320_s23 = scalar_select %p312_p4, 1, 0  ;;  %v318_v1 = vld [vmem:[%s621_s0] sm:$0x1f]  ;;  %vm325_vm0 = vcmask 1044480   ;;  %v346_v14 = vlaneseq }
  0x16   : > { %v319_v2 = vld [vmem:[%s291_s20] sm:$0x1f]  ;;  %p370_p7 = scmp.lt.s32.totalorder %s536_s12, 1 }
  0x17   : > { %v321_v3 = vstv %s320_s23  ;;  %v347_v15 = vshrl.u32 %v346_v14, 7  ;;  %v486_v16 = vld [vmem:[%s623_s2] ss:$0 sm:$0xff]  ;;  %v365_v33 = vand.u32 127, %v346_v14 }
  0x18   : > { %vm322_vm1 = vcmp.eq.s32.totalorder %v321_v3, 1  ;;  %s634_s12 = smov (!%p370_p7, %s536_s12), 1  ;;  %v372_v39 = vld [vmem:[%s624_s3] sm:$0x3] }
  0x19   : > { %v323_v4 = vsel %vm322_vm1, %v318_v1, %v319_v2  ;;  %vm352_vm2 = vcmp.eq.s32.totalorder %v347_v15, %v486_v16  ;;  %v373_v36 = vstv %s634_s12  ;;  %vm368_vm3 = vcmp.lt.s32.totalorder %v365_v33, 16 }
  0x1a   : > { %v326_v5 = vsel %vm325_vm0, %v323_v4, -inf  ;;  %v353_v17 = vsel %vm352_vm2, %v323_v4, 0.0  ;;  %vm374_vm4 = vcmp.eq.s32.totalorder %v347_v15, %v373_v36 }
  0x1b   : > { %v327_v6 = vrot.slane %v326_v5, 4  ;;  %v354_v21 = vsel %vm325_vm0, %v353_v17, 0.0 }
  0x1c   : > { %v355_v23 = vrot.slane %v354_v21, 4 }
  0x1d   : > { %v328_v7 = vmax.f32 %v326_v5, %v327_v6 }
  0x1e   : > { %v356_v26 = vadd.f32 %v355_v23, %v354_v21 }
  0x1f   : > { %v329_v8 = vrot.slane %v328_v7, 2 }
  0x20   : > { %v357_v29 = vrot.slane %v356_v26, 2 }
  0x21   : > { %v330_v9 = vmax.f32 %v328_v7, %v329_v8 }
  0x22   : > { %v358_v30 = vadd.f32 %v357_v29, %v356_v26 }
  0x23   : > { %v331_v10 = vrot.slane %v330_v9, 1 }
  0x24   : > { %v359_v31 = vrot.slane %v358_v30, 1 }
  0x25   : > { %v332_v11 = vmax.f32 %v330_v9, %v331_v10 }
  0x26   : > { %v360_v35 = vadd.f32 %v359_v31, %v358_v30 }
  0x27   : > { %v333_v12 = vsub.f32 %v323_v4, %v332_v11 }
  0x29   : > { %v334_v13 = vmul.f32 1.442695, %v333_v12 }
  0x2b   : > { %518 = vpow2.f32 %v334_v13 }
  0x35   : > { %v519_v18 = vpop.eup %518 }
  0x36   : > { %v336_v19 = vsel %vm325_vm0, %v519_v18, 0.0 }
  0x37   : > { %v337_v20 = vrot.slane %v336_v19, 4 }
  0x39   : > { %v338_v22 = vadd.f32 %v337_v20, %v336_v19 }
  0x3b   : > { %v339_v24 = vrot.slane %v338_v22, 2 }
  0x3d   : > { %v340_v25 = vadd.f32 %v339_v24, %v338_v22 }
  0x3f   : > { %v341_v27 = vrot.slane %v340_v25, 1 }
  0x41   : > { %v342_v28 = vadd.f32 %v341_v27, %v340_v25 }
  0x43   : > { %520 = vlog2.f32 %v342_v28 }
  0x4d   : > { %v521_v32 = vpop.eup %520 }
  0x4e   : > { %v344_v34 = vmul.f32 0.6931472, %v521_v32 }
  0x50   : > { %v345_v37 = vadd.f32 %v344_v34, %v332_v11 }
  0x52   : > { %v361_v38 = vsub.f32 %v345_v37, %v360_v35 }
  0x54   : > { %v369_v40 = vsel %vm368_vm3, %v361_v38, 0.0 }
  0x55   : > { %v375_v41 = vsel %vm374_vm4, %v369_v40, 0.0 }
  0x56   : > { %v376_v42 = vadd.f32 %v375_v41, %v372_v39 }
  0x58   : > { %377 = vst [vmem:[%s624_s3] sm:$0x3] %v376_v42 }
  0x59 PF: > { %s13_s14 = sadd.s32 1, %s544_s14   ;;  %s625_s12 = smov %s540_s13 }
  0x5a   : > { %p10_p8 = scmp.ge.s32.totalorder %s13_s14, 7   ;;  %s626_s13 = smov %s628_s15 }
  0x5c   :  { %12 = sbr.rel (!%p10_p8) target bundleno = 2 (0x2), region = 72 }

</bundles_post_ra>
